<compile_context>
chip_gen: v7x
topology: tpu7x:2x2x1
jax: 0.10.0
libtpu: 0.0.40
codegen_flags: <defaults>
</compile_context>

<pallas_src>
import numpy as np
import jax
import jax.numpy as jnp
from jax.experimental import pallas as pl
from jax.experimental.pallas import tpu as pltpu

_EPS = 1e-4


def _round_up(x, m):
    return (x + m - 1) // m * m


def _matmul_scale_kernel(x_ref, w_ref, s_ref, o_ref, acc_ref):
    """One (tm, tn) output tile; K contracted over the innermost grid axis.

    x_ref: [tm, tk] bf16, w_ref: [tk, tn] bf16 (raw transposed weight),
    s_ref: [1, tn] f32 per-column scale, acc_ref: [tm, tn] f32 accumulator
    resident across the K grid axis.
    """
    kk = pl.program_id(2)

    @pl.when(kk == 0)
    def _():
        acc_ref[...] = jnp.zeros_like(acc_ref)

    acc_ref[...] += jnp.dot(x_ref[...], w_ref[...],
                            preferred_element_type=jnp.float32)

    @pl.when(kk == pl.num_programs(2) - 1)
    def _():
        o_ref[...] = (acc_ref[...] * s_ref[...]).astype(o_ref.dtype)


def _tile_geometry(m, n, k):
    # Out-feature (lane / MXU-N) dim: multiples of 256 (v6e/v7x MXU 2x256^2).
    if n <= 512:
        tn = _round_up(n, 256)
        n_pad = tn
    else:
        tn, n_pad = min(((c, _round_up(n, c)) for c in (512, 256)),
                        key=lambda t: (t[1], -t[0]))
    # K (contraction): keep whole when modest, else tile in 2048 chunks.
    if k <= 2048:
        tk, k_pad = k, k
    else:
        tk = 2048
        k_pad = _round_up(k, tk)
    # Batch (sublane / MXU-M) dim: minimize pad waste, cap the tile at 512.
    if m <= 512:
        tm = _round_up(m, 8)
        m_pad = tm
    else:
        tm, m_pad = min(((c, _round_up(m, c)) for c in (512, 256, 128)),
                        key=lambda t: (t[1], -t[0]))
    # Weight-resident path: if the whole padded bf16 weight is small, make the
    # weight block the full weight -> constant block index, fetched once.
    if tk == k_pad and k_pad * n_pad * 2 <= (2 << 20):
        tn = n_pad
    # v7x has two TensorCores: ensure >= 2 programs on a parallel axis when
    # the problem allows it (split N; 128 lanes still keeps stores lane-dense).
    if m_pad // tm == 1 and n_pad // tn == 1 and tn >= 256:
        tn //= 2
    return tm, m_pad, tn, n_pad, tk, k_pad


def prepare_weight(weight, n_pad, k_pad):
    """One-time weight prep (cacheable across forward calls for a fixed weight).

    Returns the transposed, zero-padded bf16 weight [k_pad, n_pad] and the
    per-output-column f32 scale [1, n_pad] folding normalize()/sqrt(fan_in).
    """
    n, k = weight.shape
    w32 = weight.astype(jnp.float32)
    inv_sqrt_fan_in = np.float32(1.0 / np.sqrt(k))
    col_norm = jnp.sqrt(jnp.sum(w32 * w32, axis=1))                     # [N]
    scale = inv_sqrt_fan_in / (np.float32(_EPS) + col_norm * inv_sqrt_fan_in)
    scale = jnp.pad(scale, (0, n_pad - n)).reshape(1, n_pad)            # [1, Np]
    wt = jnp.pad(jnp.transpose(w32), ((0, k_pad - k), (0, n_pad - n)))  # [Kp, Np]
    return wt.astype(jnp.bfloat16), scale


def linear_forward(x, weight, out_dtype=None):
    """y = F.linear(x, normalize(weight)/sqrt(fan_in)).  weight: [out, in]."""
    out_features, in_features = weight.shape
    assert x.shape[-1] == in_features
    orig_lead = x.shape[:-1]
    out_dtype = x.dtype if out_dtype is None else out_dtype

    x2 = x.reshape(-1, in_features)
    m, k, n = x2.shape[0], in_features, out_features
    tm, m_pad, tn, n_pad, tk, k_pad = _tile_geometry(m, n, k)

    # TODO(synk): wt_bf16/scale depend only on the weight; cache them across
    # forward calls at a higher level instead of recomputing per call.
    wt_bf16, scale = prepare_weight(weight, n_pad, k_pad)

    if (m_pad, k_pad) != (m, k):
        x2 = jnp.pad(x2, ((0, m_pad - m), (0, k_pad - k)))
    x2 = x2.astype(jnp.bfloat16)

    grid = (m_pad // tm, n_pad // tn, k_pad // tk)

    # VMEM budget: double-buffered bf16 inputs + output + f32 accumulator.
    out_item = jnp.dtype(out_dtype).itemsize
    working = (2 * tm * tk * 2 + 2 * tk * tn * 2 + 2 * 8 * tn * 4
               + 2 * tm * tn * out_item + tm * tn * 4)
    vmem_limit = int(min(max(working * 1.5, 24 << 20), 48 << 20))

    out = pl.pallas_call(
        _matmul_scale_kernel,
        out_shape=jax.ShapeDtypeStruct((m_pad, n_pad), out_dtype),
        grid_spec=pltpu.PrefetchScalarGridSpec(
            num_scalar_prefetch=0,
            grid=grid,
            in_specs=[
                pl.BlockSpec((tm, tk), lambda i, j, kk: (i, kk)),
                pl.BlockSpec((tk, tn), lambda i, j, kk: (kk, j)),
                pl.BlockSpec((1, tn), lambda i, j, kk: (0, j)),
            ],
            out_specs=pl.BlockSpec((tm, tn), lambda i, j, kk: (i, j)),
            scratch_shapes=[pltpu.VMEM((tm, tn), jnp.float32)],
        ),
        compiler_params=pltpu.CompilerParams(
            dimension_semantics=("parallel", "parallel", "arbitrary"),
            vmem_limit_bytes=vmem_limit),
    )(x2, wt_bf16, scale)

    out = out[:m, :n]
    return out.reshape(*orig_lead, n)


def _reference_forward(x, weight):
    """Pure-JAX f32 mirror of the PyTorch Linear.forward (eval path)."""
    w32 = weight.astype(jnp.float32)
    k = w32.shape[1]
    sqrt_k = np.float32(np.sqrt(k))
    norm = jnp.sqrt(jnp.sum(w32 * w32, axis=1, keepdims=True))        # [N, 1]
    w_eff = w32 / (np.float32(_EPS) + norm / sqrt_k) / sqrt_k
    x2 = x.reshape(-1, k).astype(jnp.float32)
    y = jnp.matmul(x2, w_eff.T, precision=jax.lax.Precision.HIGHEST)
    return y.reshape(*x.shape[:-1], w32.shape[0])


if __name__ == "__main__":
    in_features = 32
    out_features = 64
    batch = 10  # deliberately not sublane-aligned: exercises the M padding

    key = jax.random.PRNGKey(0)
    k_w, k_x, k_x3 = jax.random.split(key, 3)
    weight = jax.random.normal(k_w, (out_features, in_features), jnp.float32)
    x = jax.random.normal(k_x, (batch, in_features), jnp.float32)

    y = linear_forward(x, weight)
    jax.block_until_ready(y)

    y_ref = _reference_forward(x, weight)
    assert y.shape == (batch, out_features)
    # bf16 MXU operands vs an f32 reference -> slightly relaxed tolerance.
    np.testing.assert_allclose(np.asarray(y), np.asarray(y_ref),
                               rtol=2e-2, atol=2e-2)

    # also exercise arbitrary leading dims (F.linear semantics)
    x3 = jax.random.normal(k_x3, (2, 8, in_features), jnp.float32)
    y3 = linear_forward(x3, weight)
    jax.block_until_ready(y3)
    np.testing.assert_allclose(np.asarray(y3),
                               np.asarray(_reference_forward(x3, weight)),
                               rtol=2e-2, atol=2e-2)

    print("KERNEL_OK")
</pallas_src>

<mosaic_0001>
module attributes {stable_mosaic.version = 11 : i64} {
  func.func @_matmul_scale_kernel(%arg0: i32, %arg1: i32, %arg2: i32, %arg3: memref<16x32xbf16, #tpu.memory_space<vmem>>, %arg4: memref<32x128xbf16, #tpu.memory_space<vmem>>, %arg5: memref<1x128xf32, #tpu.memory_space<vmem>>, %arg6: memref<16x128xf32, #tpu.memory_space<vmem>>, %arg7: memref<16x128xf32, #tpu.memory_space<vmem>>) attributes {dimension_semantics = [#tpu.dimension_semantics<parallel>, #tpu.dimension_semantics<parallel>, #tpu.dimension_semantics<arbitrary>], iteration_bounds = array<i64: 1, 2, 1>, scalar_prefetch = 0 : i64, scratch_operands = 1 : i64, tpu.core_type = #tpu.core_type<tc>, window_params = [{transform_indices = @transform_0, window_bounds = array<i64: 16, 32>}, {transform_indices = @transform_1, window_bounds = array<i64: 32, 128>}, {transform_indices = @transform_2, window_bounds = array<i64: 1, 128>}, {transform_indices = @transform_3, window_bounds = array<i64: 16, 128>}]} {
    %c0_i32 = arith.constant 0 : i32
    %0 = arith.cmpi eq, %arg2, %c0_i32 : i32
    %1 = arith.extui %0 : i1 to i32
    %c0_i32_0 = arith.constant 0 : i32
    %2 = arith.cmpi ne, %1, %c0_i32_0 : i32
    scf.if %2 {
      %cst_10 = arith.constant 0.000000e+00 : f32
      %12 = vector.broadcast %cst_10 : f32 to vector<16x128xf32>
      %c0_11 = arith.constant 0 : index
      %c0_12 = arith.constant 0 : index
      %13 = vector.load %arg7[%c0_11, %c0_12] : memref<16x128xf32, #tpu.memory_space<vmem>>, vector<16x128xf32>
      tpu.vector_store %arg7[%c0_11, %c0_12], %12 {strides = array<i32>} : memref<16x128xf32, #tpu.memory_space<vmem>>, vector<16x128xf32>,
    } else {
    }
    %c0 = arith.constant 0 : index
    %c0_1 = arith.constant 0 : index
    %3 = vector.load %arg7[%c0, %c0_1] : memref<16x128xf32, #tpu.memory_space<vmem>>, vector<16x128xf32>
    %c0_2 = arith.constant 0 : index
    %c0_3 = arith.constant 0 : index
    %4 = vector.load %arg3[%c0_2, %c0_3] : memref<16x32xbf16, #tpu.memory_space<vmem>>, vector<16x32xbf16>
    %c0_4 = arith.constant 0 : index
    %c0_5 = arith.constant 0 : index
    %5 = vector.load %arg4[%c0_4, %c0_5] : memref<32x128xbf16, #tpu.memory_space<vmem>>, vector<32x128xbf16>
    %cst = arith.constant dense<0.000000e+00> : vector<16x128xf32>
    %6 = tpu.matmul %4, %5, %cst {dimension_numbers = #tpu.dot_dimension_numbers<[1], [0], [0], [1], [0, 0, 1, 1], [], []>} : vector<16x32xbf16>, vector<32x128xbf16>, vector<16x128xf32> -> vector<16x128xf32>
    %7 = arith.addf %3, %6 : vector<16x128xf32>
    %c0_6 = arith.constant 0 : index
    %c0_7 = arith.constant 0 : index
    %8 = vector.load %arg7[%c0_6, %c0_7] : memref<16x128xf32, #tpu.memory_space<vmem>>, vector<16x128xf32>
    tpu.vector_store %arg7[%c0_6, %c0_7], %7 {strides = array<i32>} : memref<16x128xf32, #tpu.memory_space<vmem>>, vector<16x128xf32>,
    %c0_i32_8 = arith.constant 0 : i32
    %9 = arith.cmpi eq, %arg2, %c0_i32_8 : i32
    %10 = arith.extui %9 : i1 to i32
    %c0_i32_9 = arith.constant 0 : i32
    %11 = arith.cmpi ne, %10, %c0_i32_9 : i32
    scf.if %11 {
      %c0_10 = arith.constant 0 : index
      %c0_11 = arith.constant 0 : index
      %12 = vector.load %arg7[%c0_10, %c0_11] : memref<16x128xf32, #tpu.memory_space<vmem>>, vector<16x128xf32>
      %c0_12 = arith.constant 0 : index
      %c0_13 = arith.constant 0 : index
      %13 = vector.load %arg5[%c0_12, %c0_13] : memref<1x128xf32, #tpu.memory_space<vmem>>, vector<1x128xf32>
      %14 = vector.broadcast %13 : vector<1x128xf32> to vector<16x128xf32>
      %15 = arith.mulf %12, %14 : vector<16x128xf32>
      %c0_14 = arith.constant 0 : index
      %c0_15 = arith.constant 0 : index
      %16 = vector.load %arg6[%c0_14, %c0_15] : memref<16x128xf32, #tpu.memory_space<vmem>>, vector<16x128xf32>
      tpu.vector_store %arg6[%c0_14, %c0_15], %15 {strides = array<i32>} : memref<16x128xf32, #tpu.memory_space<vmem>>, vector<16x128xf32>,
    } else {
    }
    return
  }
  func.func @transform_0(%arg0: i32, %arg1: i32, %arg2: i32) -> (i32, i32) {
    %c0_i32 = arith.constant 0 : i32
    return %arg0, %arg2 : i32, i32
  }
  func.func @transform_1(%arg0: i32, %arg1: i32, %arg2: i32) -> (i32, i32) {
    %c0_i32 = arith.constant 0 : i32
    return %arg2, %arg1 : i32, i32
  }
  func.func @transform_2(%arg0: i32, %arg1: i32, %arg2: i32) -> (i32, i32) {
    %c0_i32 = arith.constant 0 : i32
    %c0_i32_0 = arith.constant 0 : i32
    return %c0_i32, %arg1 : i32, i32
  }
  func.func @transform_3(%arg0: i32, %arg1: i32, %arg2: i32) -> (i32, i32) {
    %c0_i32 = arith.constant 0 : i32
    return %arg0, %arg1 : i32, i32
  }
}

</mosaic_0001>

<bundles_post_ra>
// kernel: tpu_custom_call.1
= control target key start
LH: loop header
LB: loop body
LE: loop exit
PB: predicated region body
PF: predicated region fallthrough
CT: control target
= control target key end

     0   :  { %8 = vsyncpa [#allocation4], 0  ;;  %s1005_s0 = inlined_call_operand.hbm [shape: bf16[16,32], index: 0, kind: input, shape index: {}]   ;;  %s1006_s1 = inlined_call_operand.hbm [shape: bf16[32,256], index: 1, kind: input, shape index: {}]   ;;  %s1007_s2 = inlined_call_operand.vmem [shape: f32[1,256], index: 2, kind: input, shape index: {}]   ;;  %s1008_s3 = inlined_call_operand.hbm [shape: f32[16,256], index: 3, kind: output, shape index: {}]  }
   0x1   :  { %9 = vsyncpa [#allocation7], 0 }
   0x2   :  { %11 = vsyncpa [#allocation7 + $0x1], 0 }
   0x3   :  { %12 = vsyncpa [#allocation5], 0 }
   0x4   :  { %14 = vsyncpa [#allocation5 + $0x1], 0  ;;  %s775_s12 = smov 0   ;;  %s777_s13 = smov 0  }
   0x5   :  { %s779_s14 = smov 0   ;;  %s781_s15 = smov 0  }
   0x6   :  { %s783_s16 = smov 0   ;;  %s785_s17 = smov 0  }
   0x7 LB: > { %s483_s18 = sadd.s32 4294967295, %s742_s17   ;;  %s484_s19 = sadd.s32 4294967294, %s742_s17   ;;  %s742_s17 = sphi %s785_s17, %s20_s17   ;;  %s738_s16 = sphi %s783_s16, %s1036_s16   ;;  %s734_s15 = sphi %s781_s15, %s1035_s15   ;;  %s730_s14 = sphi %s779_s14, %s1034_s14   ;;  %s726_s13 = sphi %s777_s13, %s1033_s13   ;;  %s722_s12 = sphi %s775_s12, %s1032_s12  }
   0x8   : > { %p83_p0 = scmp.ne.s32.totalorder %s730_s14, %s726_s13  ;;  %p84_p1 = scmp.eq.s32.totalorder %s742_s17, 0 }
   0x9   : > { %p89_p2 = scmp.ne.s32.totalorder %s726_s13, %s722_s12  ;;  %p812_p3 = scmp.eq.s32.totalorder %s483_s18, 0 }
   0xa   : > { %p816_p4 = por %p84_p1, %p83_p0  ;;  %p141_p5 = scmp.eq.s32.totalorder %s483_s18, 1 }
   0xb   : > { %s1016_s20 = scalar_select %p812_p3, 1, 0 }
   0xc   : > { %p822_p6 = por %p812_p3, %p89_p2  ;;  %p147_p7 = scmp.eq.s32.totalorder %s484_s19, 1 }
   0xd   : > { %p826_p8 = por %p141_p5, %p83_p0  ;;  %p485_p9 = scmp.ge.s32.totalorder %s742_s17, 1 }
   0xe   : > { %s1018_s22 = scalar_select %p822_p6, 1, 0 }
   0xf   : > { %s1019_s23 = scalar_select %p826_p8, 1, 0 }
  0x10   : > { %p831_p10 = por %p147_p7, %p89_p2  ;;  %p154_p11 = scmp.lt.s32.totalorder %s742_s17, 3 }
  0x11   : > { %s744_s26 = smov [#allocation3]   ;;  %p535_p1 = scmp.lt.s32.totalorder %s742_s17, 2 }
  0x12   : > { %s1020_s24 = scalar_select %p831_p10, 1, 0 }
  0x13   : > { %p836_p12 = pnand %p485_p9, %p154_p11  ;;  %s170_s27 = sshll.u32 %s744_s26, 4  ;;  %s840_s27 = int_to_ptr.vmem [resolvable:$true] %s170_s27 }
  0x14   : > { %p854_p2 = pnand %p535_p1, %p816_p4  ;;  %s35_s30 = sadd.s32 1, %s738_s16 }
  0x15   : > { %s1021_s25 = scalar_select %p836_p12, 1, 0 }
  0x16   : > { %p522_p13 = pneg %p836_p12  ;;  %s598_s6 = scalar_lea.hbm %s1005_s0, 128 }
  0x17   : > { %s1023_s29 = scalar_select %p854_p2, 1, 0 }
  0x18   : > { %p848_p5 = pnand %p522_p13, %p812_p3  ;;  %p599_p7 = scmp.ne.s32.totalorder %s1005_s0, %s598_s6 }
  0x19   : > { %p605_p4 = scmp.lt.u32.totalorder %s598_s6, %s1005_s0 }
  0x1a   : > { %p600_p9 = pneg %p848_p5 }
  0x1c   : > { %p601_p11 = pnand %p600_p9, %p599_p7 }
  0x1e   : > { %p602_p13 = pneg %p601_p11 }
  0x20   : > { %p607_p1 = pnand %p605_p4, %p602_p13 }
  0x22   : > { %610 = shalt.err (!%p607_p1)
}
  0x23   : > { %s611_s11 = scalar_lea.vmem %s840_s27, 128  ;;  %p619_p6 = scmp.lt.s32.totalorder %s840_s27, %s840_s27 }
  0x24   : > { %p612_p0 = scmp.ne.s32.totalorder %s840_s27, %s611_s11  ;;  %p620_p3 = scmp.lt.s32.totalorder %s611_s11, %s611_s11 }
  0x26   : > { %p614_p10 = pnand %p612_p0, %p600_p9  ;;  %p621_p12 = por %p620_p3, %p619_p6 }
  0x28   : > { %p615_p8 = pneg %p614_p10 }
  0x2a   : > { %p622_p2 = pnand %p621_p12, %p615_p8 }
  0x2c   : > { %625 = shalt.err (!%p622_p2)
}
  0x2d   : > { %s1015_s18 = smov 64   ;;  %s746_s19 = smov 4  }
  0x2e   : > { %525 = dma.hbm_to_vmem [thread:$0]  (!%p848_p5), %s1005_s0, 128, %s840_s27, [#allocation4], %s1015_s18, %s1015_s18, %s746_s19  }
  0x2f   : > { %p37_p3 = scmp.ge.s32.totalorder %s35_s30, 2  ;;  %s76_s4 = sadd.s32 1, %s730_s14 }
  0x30   : > { %s184_s5 = sand.u32 1, %s730_s14   ;;  %s489_s8 = sshll.u32 %s738_s16, 6 }
  0x31   : > { %s1038_s30 = smov (%p37_p3, %s35_s30), 0  ;;  %s488_s6 = sshll.u32 %s184_s5, 4 }
  0x32   : > { %s72_s7 = ssub.s32 %s738_s16, %s1038_s30  ;;  %s893_s10 = scalar_lea.hbm %s1006_s1, %s489_s8 }
  0x33   : > { %p74_p6 = scmp.eq.s32.totalorder %s72_s7, 0  ;;  %s188_s27 = scalar_lea.vmem [#allocation6], %s488_s6 }
  0x34   : > { %s197_s11 = sshll.u32 %s188_s27, 4  ;;  %s900_s26 = scalar_lea.sflag [#allocation7], %s184_s5  ;;  %s898_s11 = int_to_ptr.vmem [resolvable:$true] %s197_s11 }
  0x35   : > { %s896_s21 = scalar_select %p74_p6, %s730_s14, %s76_s4  }
  0x36   : > { %s626_s18 = scalar_lea.hbm %s893_s10, 256  ;;  %p1024_p10 = scmp.ne.s32.totalorder %s1023_s29, 0 }
  0x37   : > { %p627_p8 = scmp.ne.s32.totalorder %s893_s10, %s626_s18  ;;  %s631_s28 = scalar_lea.hbm %s1006_s1, 512 }
  0x38   : > { %p628_p12 = pneg %p1024_p10  ;;  %p632_p2 = scmp.lt.u32.totalorder %s893_s10, %s1006_s1 }
  0x39   : > { %p633_p7 = scmp.lt.u32.totalorder %s631_s28, %s626_s18  ;;  %p635_p11 = scmp.lt.u32.totalorder %s626_s18, %s893_s10 }
  0x3a   : > { %p629_p0 = pnand %p628_p12, %p627_p8 }
  0x3b   : > { %p634_p9 = por %p633_p7, %p632_p2 }
  0x3c   : > { %p630_p5 = pneg %p629_p0 }
  0x3d   : > { %p636_p13 = por %p635_p11, %p634_p9 }
  0x3f   : > { %p637_p4 = pnand %p636_p13, %p630_p5 }
  0x41   : > { %640 = shalt.err (!%p637_p4)
}
  0x42   : > { %s641_s4 = scalar_lea.vmem %s898_s11, 256  ;;  %s747_s5 = smov [#allocation6]  }
  0x43   : > { %p642_p1 = scmp.ne.s32.totalorder %s898_s11, %s641_s4  ;;  %s646_s27 = sshll.u32 %s747_s5, 4  ;;  %s647_s27 = int_to_ptr.vmem [resolvable:$false] %s646_s27 }
  0x44   : > { %s648_s7 = scalar_lea.vmem %s647_s27, 512  ;;  %p649_p8 = scmp.lt.s32.totalorder %s898_s11, %s647_s27 }
  0x45   : > { %p644_p3 = pnand %p642_p1, %p628_p12  ;;  %p650_p0 = scmp.lt.s32.totalorder %s648_s7, %s641_s4 }
  0x47   : > { %p645_p6 = pneg %p644_p3  ;;  %p651_p2 = por %p650_p0, %p649_p8 }
  0x49   : > { %p652_p7 = pnand %p651_p2, %p645_p6 }
  0x4b   : > { %655 = shalt.err (!%p652_p7)
}
  0x4c   : > { %s748_s18 = smov 128   ;;  %s1025_s8 = smov 64  }
  0x4d   : > { %529 = dma.hbm_to_vmem [thread:$0]  (!%p1024_p10), %s893_s10, 256, %s898_s11, %s900_s26, %s748_s18, %s1025_s8, %s746_s19  }
  0x4e   : > { %p1026_p12 = scmp.ne.s32.totalorder %s1021_s25, 0 }
  0x4f   : > { %p1027_p5 = scmp.ne.s32.totalorder (!%p1026_p12), %s1016_s20, 0 }
  0x50   : > { %215 = sbr.rel (%p1026_p12) target bundleno = 333 (0x14d), region = 32 }
  0x57   : > { %709 = dma.done.wait (%p1027_p5), [#allocation4], 128  }
  0x58   : > { %711 = vsyncadd (%p1027_p5), [#allocation4], 4294967168  ;;  %s937_s28 = sand.u32 1, %s726_s13   ;;  %p1028_p9 = scmp.ne.s32.totalorder %s1018_s22, 0 }
  0x59   : > { %s492_s29 = sshll.u32 %s937_s28, 4  ;;  %s222_s6 = scalar_lea.sflag [#allocation7], %s937_s28 }
  0x5a   : > { %s225_s9 = scalar_lea.vmem [#allocation6], %s492_s29 }
  0x5b   : > { %713 = dma.done.wait (%p1028_p9), %s222_s6, 256  }
  0x5c   : > { %715 = vsyncadd (%p1028_p9), %s222_s6, 4294967040  ;;  %v749_v0 = vmov 0.0   ;;  %vm750_vm0 = vmmov 0   ;;  %v595_v1 = vld [vmem:[%s225_s9] sm:$0xff]   ;;  %v596_v2 = vld [vmem:[%s225_s9 + $0x8] sm:$0xff]   ;;  %vm289_vm1 = vcmask 261120  }
  0x5d   : > { %506 = vmatprep.subr.bf16.mxu0 %v749_v0  ;;  %510 = vmatprep.mubr.msk.bf16.mxu0 %vm750_vm0, %v749_v0  ;;  %v597_v3 = vld [vmem:[#allocation3] sm:$0xff]   ;;  %p253_p10 = scmp.lt.s32.totalorder %s734_s15, 1  ;;  %s250_s10 = scalar_lea.vmem [#allocation8], %s492_s29 }
  0x5e   : > { %507 = vmatpush3.bf16.msra.mxu0 %v595_v1  ;;  %s370_s11 = sshll.u32 %s250_s10, 4  ;;  %s500_s26 = sshll.u32 %s734_s15, 7  ;;  %s951_s11 = int_to_ptr.vmem [resolvable:$true] %s370_s11 }
  0x5f   : > { %508 = vmatprep.subr.bf16.mxu0 %v749_v0  ;;  %s254_s20 = scalar_select %p253_p10, %s734_s15, 1 }
  0x60   : > { %s956_s27 = scalar_lea.hbm %s1008_s3, %s500_s26  ;;  %s355_s7 = scalar_lea.sflag [#allocation5], %s937_s28 }
  0x61   : > { %s255_s19 = scalar_lea.vmem %s1007_s2, %s254_s20  ;;  %s656_s15 = scalar_lea.vmem %s951_s11, 256 }
  0x62   : > { %509 = vmatpush3.bf16.msra.mxu0 %v596_v2  ;;  %v498_v4 = vld [vmem:[%s255_s19] ss:$0 sm:$0xff]  ;;  %p657_p11 = scmp.ne.s32.totalorder %s951_s11, %s656_s15  ;;  %p1029_p13 = scmp.ne.s32.totalorder %s1019_s23, 0 }
  0x63   : > { %s751_s18 = smov [#allocation8]  }
  0x64   : > { %p658_p4 = pnand %p657_p11, %p1029_p13  ;;  %s660_s8 = sshll.u32 %s751_s18, 4  ;;  %s661_s8 = int_to_ptr.vmem [resolvable:$false] %s660_s8 }
  0x65   : > { %511 = vmatmul.mubr.msk.bf16.vlgmr.msra.gmra.mrb[0].mxu0 %vm289_vm1, %v597_v3  ;;  %s662_s29 = scalar_lea.vmem %s661_s8, 512  ;;  %p663_p3 = scmp.lt.s32.totalorder %s951_s11, %s661_s8 }
  0x66   : > { %p659_p1 = pneg %p658_p4  ;;  %p664_p6 = scmp.lt.s32.totalorder %s662_s29, %s656_s15 }
  0x68   : > { %p665_p8 = por %p664_p6, %p663_p3 }
  0x6a   : > { %p666_p0 = pnand %p665_p8, %p659_p1 }
 0x138   : > { %v327_v5 = vpop.f32.mrb[0].mxu0 }
 0x139   : > { %v350_v6 = vmul.f32 %v498_v4, %v327_v5  ;;  %v512_v7 = vpop.f32.mrb[1].mxu0 }
 0x13a   : > { %v330_v8 = vpop.f32.mrb[2].mxu0 }
 0x13b   : > { %352 = vst [vmem:[%s250_s10] sm:$0xff] %v350_v6  ;;  %v351_v9 = vmul.f32 %v498_v4, %v330_v8  ;;  %v513_v10 = vpop.f32.mrb[3].mxu0 }
 0x13d   : > { %353 = vst [vmem:[%s250_s10 + $0x8] sm:$0xff] %v351_v9 }
 0x13e   : > { %669 = shalt.err (!%p666_p0)
}
 0x13f   : > { %s670_s6 = scalar_lea.hbm %s956_s27, 256  ;;  %s674_s25 = scalar_lea.hbm %s1008_s3, 512 }
 0x140   : > { %p671_p2 = scmp.ne.s32.totalorder %s956_s27, %s670_s6  ;;  %p675_p5 = scmp.lt.u32.totalorder %s956_s27, %s1008_s3 }
 0x141   : > { %p676_p9 = scmp.lt.u32.totalorder %s674_s25, %s670_s6  ;;  %p678_p11 = scmp.lt.u32.totalorder %s670_s6, %s956_s27 }
 0x142   : > { %p672_p7 = pnand %p671_p2, %p1029_p13 }
 0x143   : > { %p677_p10 = por %p676_p9, %p675_p5 }
 0x144   : > { %p673_p12 = pneg %p672_p7 }
 0x145   : > { %p679_p4 = por %p678_p11, %p677_p10 }
 0x147   : > { %p680_p1 = pnand %p679_p4, %p673_p12 }
 0x149   : > { %683 = shalt.err (!%p680_p1)
}
 0x14a   : > { %s752_s10 = smov 128   ;;  %s753_s26 = smov 256  }
 0x14b   : > { %s754_s4 = smov 8  }
 0x14c   : > { %520 = dma.vmem_to_hbm [thread:$0]  (%p1029_p13), %s951_s11, 256, %s956_s27, %s355_s7, %s752_s10, %s753_s26, %s754_s4  }
 0x14d PF: > { %s385_s5 = sand.u32 1, %s722_s12   ;;  %p1030_p3 = scmp.ne.s32.totalorder %s1020_s24, 0 }
 0x14e   : > { %p1031_p6 = scmp.ge.s32.totalorder %s742_s17, 2  ;;  %s386_s15 = scalar_lea.sflag [#allocation5], %s385_s5 }
 0x150   : > { %p531_p8 = pnand %p1031_p6, %p1030_p3 }
 0x152   : > { %717 = dma.done.wait (!%p531_p8), %s386_s15, 256  }
 0x153   : > { %719 = vsyncadd (!%p531_p8), %s386_s15, 4294967040  ;;  %s20_s17 = sadd.s32 1, %s742_s17   ;;  %s1032_s12 = smov %s726_s13 }
 0x154   : > { %p17_p0 = scmp.ge.s32.totalorder %s20_s17, 4   ;;  %s1033_s13 = smov %s730_s14 }
 0x155   : > { %s1034_s14 = smov %s896_s21  ;;  %s1035_s15 = smov %s738_s16 }
 0x156   : > { %s1036_s16 = smov %s1038_s30  ;;  %19 = sbr.rel (!%p17_p0) target bundleno = 7 (0x7), region = 94 }
 0x15d   :  { %391 = vsyncpa [#allocation4], 1 }
 0x15e   :  { %393 = vsyncpa [#allocation4 + $0x1], 1 }
 0x15f   :  { %394 = vsyncpa [#allocation7], 1 }
 0x160   :  { %396 = vsyncpa [#allocation7 + $0x1], 1 }
 0x161   :  { %397 = vsyncpa [#allocation5], 1 }
 0x162   :  { %399 = vsyncpa [#allocation5 + $0x1], 1 }

</bundles_post_ra>
